<compile_context>
chip_gen: v6e
topology: v6e:2x2x1
jax: 0.10.0
libtpu: 0.0.40
codegen_flags: <defaults>
</compile_context>

<pallas_src>
import functools
import math

import jax
import jax.numpy as jnp
from jax.experimental import pallas as pl
from jax.experimental.pallas import tpu as pltpu


_BLOCK_BYTES_CAP = 2 << 20     # ~2 MiB of output bytes per block (per output)
_MIN_TILE_ROWS = 512           # keep the ~0.35 us per-step overhead small
_TARGET_GRID_STEPS = 8         # >= 4 steps per TensorCore on dual-core chips


def _rotary_kernel(lanes_ref, cos_ref, sin_ref, *, k, compute_half):
    """Fill one (tile_rows, W_out) tile of the packed cos/sin caches.

    lanes_ref : (2, W) f32 in VMEM
        row 0 = inv_freq value for each compute lane
        row 1 = packed position offset (lane // emb_dim) for each compute lane
    cos_ref / sin_ref : (tile_rows, cols) output tiles.
        Packed path: cols == k * emb_dim, each row holds k consecutive
        positions.  compute_half path: W == emb_dim // 2 and the trig result
        is duplicated along lanes after the down-cast.
    """
    tile_rows = cos_ref.shape[0]
    inv_f = lanes_ref[0:1, :]                                   # (1, W)

    # Position of output row r, packed slot i:  start + r*k + i  (exact f32
    # integers for all practical context lengths).
    start = (pl.program_id(0) * (tile_rows * k)).astype(jnp.float32)
    row_t = start + k * jax.lax.broadcasted_iota(
        jnp.int32, (tile_rows, 1), 0).astype(jnp.float32)       # (R, 1)
    if k > 1:
        t = row_t + lanes_ref[1:2, :]                           # (R, W)
    else:
        t = row_t                                               # broadcasts below

    freqs = t * inv_f                                           # (R, W)
    c = jnp.cos(freqs).astype(cos_ref.dtype)
    s = jnp.sin(freqs).astype(sin_ref.dtype)
    if compute_half:
        # emb = cat([freqs, freqs], -1): duplicate the (already down-cast)
        # half-width result with a lane copy instead of re-running the EUP.
        c = jnp.concatenate([c, c], axis=-1)
        s = jnp.concatenate([s, s], axis=-1)
    cos_ref[...] = c
    sin_ref[...] = s


def _pick_tile_rows(rows_total, cols, out_dtype):
    """Dtype-aware block sizing with a multi-step, megacore-friendly grid."""
    itemsize = jnp.dtype(out_dtype).itemsize
    granule = max(8, 32 // max(itemsize, 1))     # sublane granule per dtype
    if rows_total <= granule:
        return rows_total                        # single full-extent block

    def round_up(x):
        return -(-x // granule) * granule

    # ~2 MiB of output bytes per block, sized by the actual output itemsize.
    row_cap = max(granule,
                  ((_BLOCK_BYTES_CAP // (itemsize * cols)) // granule) * granule)
    # Aim for >= _TARGET_GRID_STEPS grid steps while keeping blocks >= ~512
    # rows so per-step overhead stays small and writeback overlaps compute.
    tile = round_up(max(-(-rows_total // _TARGET_GRID_STEPS),
                        min(_MIN_TILE_ROWS, row_cap)))
    tile = min(tile, row_cap)
    if tile >= rows_total:
        return rows_total                        # exact full-extent block
    return tile


def _vmem_limit_bytes(tile_rows, cols, out_dtype):
    """2 outputs x 2 buffers + block-sized f32 intermediates + margin."""
    block = tile_rows * cols * jnp.dtype(out_dtype).itemsize
    temps = 6 * tile_rows * cols * 4             # conservative f32 temp budget
    need = 4 * block + temps + (2 << 20)
    # Raise past v5e's 16 MiB scoped default; stay well under v7x's 64 MiB
    # physical VMEM per TensorCore.
    return int(min(max(need, 16 << 20), 40 << 20))


@functools.partial(
    jax.jit,
    static_argnames=("seq_len", "out_dtype", "tile_rows", "k", "compute_half"),
)
def _rotary_pallas(inv_freq, *, seq_len, out_dtype, tile_rows, k, compute_half):
    half = inv_freq.shape[0]
    emb_dim = 2 * half                      # width of the returned cache rows
    cols = k * emb_dim
    rows_total = -(-seq_len // k)           # ceil(seq_len / k)
    seq_pad = rows_total * k

    inv_freq = inv_freq.astype(jnp.float32)
    if compute_half:
        freq_lanes = inv_freq                               # (half,)
        poff_lanes = jnp.zeros((half,), jnp.float32)
        w = half
    else:
        dup = jnp.concatenate([inv_freq, inv_freq])         # (emb_dim,)
        freq_lanes = jnp.tile(dup, k)                       # (k*emb_dim,)
        poff_lanes = jnp.repeat(jnp.arange(k, dtype=jnp.float32), emb_dim)
        w = cols
    lanes = jnp.stack([freq_lanes, poff_lanes])             # (2, W)

    grid = (pl.cdiv(rows_total, tile_rows),)
    kernel = functools.partial(_rotary_kernel, k=k, compute_half=compute_half)

    cos_packed, sin_packed = pl.pallas_call(
        kernel,
        out_shape=(
            jax.ShapeDtypeStruct((rows_total, cols), out_dtype),
            jax.ShapeDtypeStruct((rows_total, cols), out_dtype),
        ),
        grid_spec=pltpu.PrefetchScalarGridSpec(
            num_scalar_prefetch=0,
            grid=grid,
            in_specs=[pl.BlockSpec((2, w), lambda i: (0, 0))],
            out_specs=[
                pl.BlockSpec((tile_rows, cols), lambda i: (i, 0)),
                pl.BlockSpec((tile_rows, cols), lambda i: (i, 0)),
            ],
        ),
        compiler_params=pltpu.CompilerParams(
            dimension_semantics=("parallel",),
            vmem_limit_bytes=_vmem_limit_bytes(tile_rows, cols, out_dtype),
        ),
    )(lanes)

    # (rows_total, k*emb_dim) -> (seq_pad, emb_dim) is a free row-major
    # reshape; only a ragged seq_len (seq_len % k != 0) pays a slice copy.
    cos2d = cos_packed.reshape(seq_pad, emb_dim)
    sin2d = sin_packed.reshape(seq_pad, emb_dim)
    if seq_pad != seq_len:
        cos2d = cos2d[:seq_len]
        sin2d = sin2d[:seq_len]

    # PyTorch returns cos_cached[:, :, :seq_len, :] -> (1, 1, seq, dim)
    return cos2d[None, None, :, :], sin2d[None, None, :, :]


class RotaryEmbedding:
    """JAX/Pallas port of the PyTorch RotaryEmbedding module's forward."""

    def __init__(self, dim, max_position_embeddings=4096, base=10000.0):
        self.dim = int(dim)
        self.base = float(base)
        self.max_seq_len_cached = int(max_position_embeddings)
        # inv_freq = 1 / base ** (arange(0, dim, 2) / dim)   shape (ceil(dim/2),)
        self.inv_freq = 1.0 / self.base ** (
            jnp.arange(0, dim, 2, dtype=jnp.float32) / dim)

    def __call__(self, x, seq_len=None):
        # x is used only for its dtype (matching the PyTorch forward).
        seq_len = int(seq_len)
        if seq_len > self.max_seq_len_cached:
            self.max_seq_len_cached = seq_len

        emb_dim = 2 * int(self.inv_freq.shape[0])   # == dim for even dim
        # Lane-packing factor: smallest k with (k * emb_dim) % 128 == 0 so the
        # output last dim stays lane-dense (full, unmasked stores + wide DMA).
        k = 128 // math.gcd(emb_dim, 128)
        if k * emb_dim > 8192:                      # pathological (odd) dims
            k = 1
        # Wide dims: evaluate trig on the unique half and duplicate with a
        # lane copy. Only a win once half >= one full 128-lane vreg.
        compute_half = (k == 1 and emb_dim >= 256)

        rows_total = -(-seq_len // k)
        tile_rows = _pick_tile_rows(rows_total, k * emb_dim, x.dtype)

        return _rotary_pallas(
            self.inv_freq,
            seq_len=seq_len,
            out_dtype=jnp.dtype(x.dtype),
            tile_rows=int(tile_rows),
            k=int(k),
            compute_half=bool(compute_half),
        )


def _reference(inv_freq, seq_len, dtype):
    t = jnp.arange(seq_len, dtype=jnp.float32)
    freqs = jnp.einsum("i,j->ij", t, inv_freq.reshape(-1))
    emb = jnp.concatenate([freqs, freqs], axis=-1)
    return (jnp.cos(emb)[None, None].astype(dtype),
            jnp.sin(emb)[None, None].astype(dtype))


if __name__ == "__main__":
    key = jax.random.PRNGKey(0)

    # Primary small case: batch=2, heads=4, seq=8, head_dim=32 (lane-packed k=4).
    batch, heads, seq_len, dim = 2, 4, 8, 32
    x = jax.random.normal(key, (batch, heads, seq_len, dim), dtype=jnp.float32)

    rope = RotaryEmbedding(dim, max_position_embeddings=64)
    cos, sin = jax.block_until_ready(rope(x, seq_len=seq_len))
    assert cos.shape == (1, 1, seq_len, dim), cos.shape
    assert sin.shape == (1, 1, seq_len, dim), sin.shape
    assert cos.dtype == x.dtype and sin.dtype == x.dtype
    ref_cos, ref_sin = _reference(rope.inv_freq, seq_len, x.dtype)
    assert jnp.allclose(cos, ref_cos, atol=1e-5, rtol=1e-5)
    assert jnp.allclose(sin, ref_sin, atol=1e-5, rtol=1e-5)

    # bf16 output + ragged seq (seq % k != 0) + lane packing k=2.
    dim2, seq2 = 64, 201
    rope2 = RotaryEmbedding(dim2, max_position_embeddings=256)
    x2 = jnp.zeros((1, 1, seq2, dim2), dtype=jnp.bfloat16)
    cos2, sin2 = jax.block_until_ready(rope2(x2, seq_len=seq2))
    rc2, rs2 = _reference(rope2.inv_freq, seq2, jnp.bfloat16)
    assert cos2.shape == (1, 1, seq2, dim2) and cos2.dtype == jnp.bfloat16
    assert jnp.allclose(cos2.astype(jnp.float32), rc2.astype(jnp.float32), atol=2e-2)
    assert jnp.allclose(sin2.astype(jnp.float32), rs2.astype(jnp.float32), atol=2e-2)

    # Wide dim (half-width trig + lane-duplicate), single full-extent block.
    dim3, seq3 = 256, 40
    rope3 = RotaryEmbedding(dim3, max_position_embeddings=64)
    x3 = jnp.zeros((1, 1, seq3, dim3), dtype=jnp.float32)
    cos3, sin3 = jax.block_until_ready(rope3(x3, seq_len=seq3))
    rc3, rs3 = _reference(rope3.inv_freq, seq3, jnp.float32)
    assert jnp.allclose(cos3, rc3, atol=1e-5, rtol=1e-5)
    assert jnp.allclose(sin3, rs3, atol=1e-5, rtol=1e-5)

    # Head dim that does not divide 128 (k=4 -> cols=384 stays lane-dense).
    dim4, seq4 = 96, 64
    rope4 = RotaryEmbedding(dim4, max_position_embeddings=128)
    x4 = jnp.zeros((1, 1, seq4, dim4), dtype=jnp.float32)
    cos4, sin4 = jax.block_until_ready(rope4(x4, seq_len=seq4))
    rc4, rs4 = _reference(rope4.inv_freq, seq4, jnp.float32)
    assert jnp.allclose(cos4, rc4, atol=1e-5, rtol=1e-5)
    assert jnp.allclose(sin4, rs4, atol=1e-5, rtol=1e-5)

    # Long sequence: multi-step grid (8 blocks of 512 rows), megacore split.
    dim5, seq5 = 128, 4096
    rope5 = RotaryEmbedding(dim5, max_position_embeddings=4096)
    x5 = jnp.zeros((1, 1, seq5, dim5), dtype=jnp.float32)
    cos5, sin5 = jax.block_until_ready(rope5(x5, seq_len=seq5))
    rc5, rs5 = _reference(rope5.inv_freq, seq5, jnp.float32)
    assert jnp.allclose(cos5, rc5, atol=2e-3)
    assert jnp.allclose(sin5, rs5, atol=2e-3)

    print("KERNEL_OK")
</pallas_src>

<mosaic_0001>
module attributes {stable_mosaic.version = 11 : i64} {
  func.func @_rotary_kernel(%arg0: i32, %arg1: memref<2x128xf32, #tpu.memory_space<vmem>>, %arg2: memref<2x128xf32, #tpu.memory_space<vmem>>, %arg3: memref<2x128xf32, #tpu.memory_space<vmem>>) attributes {dimension_semantics = [#tpu.dimension_semantics<parallel>], iteration_bounds = array<i64: 1>, scalar_prefetch = 0 : i64, scratch_operands = 0 : i64, tpu.core_type = #tpu.core_type<tc>, window_params = [{pipeline_mode = #tpu.pipeline_mode<synchronous>, transform_indices = @transform_0, window_bounds = array<i64: 2, 128>}, {transform_indices = @transform_1, window_bounds = array<i64: 2, 128>}, {transform_indices = @transform_2, window_bounds = array<i64: 2, 128>}]} {
    %c0 = arith.constant 0 : index
    %c0_0 = arith.constant 0 : index
    %0 = vector.load %arg1[%c0, %c0_0] : memref<2x128xf32, #tpu.memory_space<vmem>>, vector<1x128xf32>
    %c8_i32 = arith.constant 8 : i32
    %1 = arith.muli %arg0, %c8_i32 : i32
    %2 = arith.sitofp %1 : i32 to f32
    %3 = tpu.iota {dimensions = array<i32: 0>} : vector<2x1xi32>
    %4 = arith.sitofp %3 : vector<2x1xi32> to vector<2x1xf32>
    %cst = arith.constant 4.000000e+00 : f32
    %5 = vector.broadcast %cst : f32 to vector<2x1xf32>
    %6 = arith.mulf %5, %4 : vector<2x1xf32>
    %7 = vector.broadcast %2 : f32 to vector<2x1xf32>
    %8 = arith.addf %7, %6 : vector<2x1xf32>
    %c1 = arith.constant 1 : index
    %c0_1 = arith.constant 0 : index
    %9 = vector.load %arg1[%c1, %c0_1] : memref<2x128xf32, #tpu.memory_space<vmem>>, vector<1x128xf32>
    %10 = vector.broadcast %8 : vector<2x1xf32> to vector<2x128xf32>
    %11 = vector.broadcast %9 : vector<1x128xf32> to vector<2x128xf32>
    %12 = arith.addf %10, %11 : vector<2x128xf32>
    %13 = vector.broadcast %0 : vector<1x128xf32> to vector<2x128xf32>
    %14 = arith.mulf %12, %13 : vector<2x128xf32>
    %15 = math.cos %14 : vector<2x128xf32>
    %16 = math.sin %14 : vector<2x128xf32>
    %c0_2 = arith.constant 0 : index
    %c0_3 = arith.constant 0 : index
    %17 = vector.load %arg2[%c0_2, %c0_3] : memref<2x128xf32, #tpu.memory_space<vmem>>, vector<2x128xf32>
    tpu.vector_store %arg2[%c0_2, %c0_3], %15 {strides = array<i32>} : memref<2x128xf32, #tpu.memory_space<vmem>>, vector<2x128xf32>,
    %c0_4 = arith.constant 0 : index
    %c0_5 = arith.constant 0 : index
    %18 = vector.load %arg3[%c0_4, %c0_5] : memref<2x128xf32, #tpu.memory_space<vmem>>, vector<2x128xf32>
    tpu.vector_store %arg3[%c0_4, %c0_5], %16 {strides = array<i32>} : memref<2x128xf32, #tpu.memory_space<vmem>>, vector<2x128xf32>,
    return
  }
  func.func @transform_0(%arg0: i32) -> (i32, i32) {
    %c0_i32 = arith.constant 0 : i32
    %c0_i32_0 = arith.constant 0 : i32
    %c0_i32_1 = arith.constant 0 : i32
    return %c0_i32, %c0_i32_0 : i32, i32
  }
  func.func @transform_1(%arg0: i32) -> (i32, i32) {
    %c0_i32 = arith.constant 0 : i32
    %c0_i32_0 = arith.constant 0 : i32
    return %arg0, %c0_i32 : i32, i32
  }
  func.func @transform_2(%arg0: i32) -> (i32, i32) {
    %c0_i32 = arith.constant 0 : i32
    %c0_i32_0 = arith.constant 0 : i32
    return %arg0, %c0_i32 : i32, i32
  }
}

</mosaic_0001>

<bundles_post_ra>
// kernel: tile.8
= control target key start
LH: loop header
LB: loop body
LE: loop exit
PB: predicated region body
PF: predicated region fallthrough
CT: control target
= control target key end

     0   :  { %s22_s0 = inlined_call_operand.vmem [shape: f32[32], index: 0, kind: input, shape index: {}]   ;;  %s23_s1 = inlined_call_operand.vmem [shape: f32[4,32], index: 1, kind: output, shape index: {}]  }
   0x1   :  { %v4_v0 = vld [vmem:[%s22_s0] ss:$0 sm:$0xff] }
   0x2   :  { %5 = vst [vmem:[%s23_s1] sm:$0xf] %v4_v0 }

// kernel: tile.9
= control target key start
LH: loop header
LB: loop body
LE: loop exit
PB: predicated region body
PF: predicated region fallthrough
CT: control target
= control target key end

     0   :  { %vm8_vm0 = vcmask 261120   ;;  %s40_s8 = smov 32   ;;  %s41_s9 = smov 64   ;;  %vm14_vm1 = vcmask 1048320   ;;  %vm20_vm2 = vcmask 785920   ;;  %vm26_vm3 = vcmask 523520   ;;  %s58_s0 = inlined_call_operand.vmem [shape: f32[4,32], index: 0, kind: input, shape index: {}]   ;;  %s59_s1 = inlined_call_operand.vmem [shape: f32[1,128], index: 1, kind: output, shape index: {}]  }
   0x1   :  { %v5_v0 = vld [vmem:[%s58_s0] sm:$0xf]  ;;  %s39_s0 = smov 96  }
   0x2   :  { %6 = vst [vmem:[#allocation1] sm:$0xf] %v5_v0 }
   0x9   :  { %v11_v1 = vld [vmem:[#allocation1 + $0x3] sm:$0x1]   ;;  %v23_v2 = vld [vmem:[#allocation1 + $0x1] sm:$0x1]   ;;  %v7_v3 = vld [vmem:[#allocation1] sm:$0x1]  }
   0xa   :  { %12 = vrot.lane.b32.xlu0 %v11_v1, %s39_s0  ;;  %24 = vrot.lane.b32.xlu1 %v23_v2, %s40_s8  ;;  %v17_v4 = vld [vmem:[#allocation1 + $0x2] sm:$0x1]   ;;  %9 = vst.msk [vmem:[#allocation0] sm:$0x1] %vm8_vm0, %v7_v3  }
   0xe   :  { %18 = vrot.lane.b32.xlu0 %v17_v4, %s41_s9 }
  0x7c   :  { %v13_v5 = vpop.permute.xlu0 %12   ;;  %v25_v6 = vpop.permute.xlu1 %24  }
  0x7d   :  { %15 = vst.msk [vmem:[#allocation0] sm:$0x1] %vm14_vm1, %v13_v5  }
  0x80   :  { %v19_v7 = vpop.permute.xlu0 %18  }
  0x81   :  { %21 = vst.msk [vmem:[#allocation0] sm:$0x1] %vm20_vm2, %v19_v7  }
  0x82   :  { %27 = vst.msk [vmem:[#allocation0] sm:$0x1] %vm26_vm3, %v25_v6  }
  0x89   :  { %v32_v8 = vld [vmem:[#allocation0] sm:$0x1] }
  0x8a   :  { %35 = vst [vmem:[%s59_s1] sm:$0x1] %v32_v8 }

// kernel: _rotary_pallas.1
= control target key start
LH: loop header
LB: loop body
LE: loop exit
PB: predicated region body
PF: predicated region fallthrough
CT: control target
= control target key end

     0   :  { %v13_v0 = vlaneseq  ;;  %v271_v19 = vmov 683565275   ;;  %v272_v21 = vmov 2475754826   ;;  %v273_v23 = vmov 2131351028   ;;  %s325_s0 = inlined_call_operand.vmem [shape: f32[2,128], index: 0, kind: input, shape index: {}]   ;;  %s326_s1 = inlined_call_operand.vmem [shape: f32[2,128], index: 1, kind: output, shape index: {0}]   ;;  %s327_s2 = inlined_call_operand.vmem [shape: f32[2,128], index: 2, kind: output, shape index: {1}]  }
   0x1   :  { %v247_v3 = vld [vmem:[%s325_s0 + $0x1] ss:$0 sm:$0xff]  ;;  %v248_v5 = vld [vmem:[%s325_s0] ss:$0 sm:$0xff]  ;;  %v274_v25 = vmov 2102212464  }
   0x2   :  { %v14_v1 = vshrl.u32 %v13_v0, 7  ;;  %v275_v27 = vmov 920167782   ;;  %v276_v34 = vmov 1326507024  }
   0x4   :  { %v15_v2 = vcvt.s32.f32 %v14_v1 }
   0x6   :  { %v16_v4 = vmul.f32 4.0, %v15_v2 }
   0x8   :  { %v24_v6 = vadd.f32 %v247_v3, %v16_v4 }
   0xa   :  { %v298_v7 = vmul.f32 %v248_v5, %v24_v6 }
   0xc   :  { %v33_v8 = vand.u32 2139095040, %v298_v7  ;;  %v30_v10 = vand.u32 2147483647, %v298_v7  ;;  %vm32_vm7 = vcmp.lt.s32.totalorder %v298_v7, 0  ;;  %vm122_vm15 = vweird.f32 %v298_v7 }
   0xe   :  { %v34_v9 = vshrl.u32 %v33_v8, 23  ;;  %v37_v13 = vand.u32 8388607, %v30_v10  ;;  %vm31_vm8 = vcmp.le.f32.partialorder %v30_v10, 0.7853982 }
  0x10   :  { %v249_v11 = vadd.s32 4294967169, %v34_v9  ;;  %v38_v16 = vor.u32 8388608, %v37_v13 }
  0x12   :  { %v40_v12 = vadd.s32 1, %v249_v11  ;;  %v78_v36 = vshll.u32 %v38_v16, 8 }
  0x14   :  { %vm41_vm0 = vcmp.gt.s32.totalorder %v40_v12, 0 }
  0x15   :  { %v42_v14 = vsel %vm41_vm0, %v40_v12, 0 }
  0x16   :  { %v44_v15 = vand.u32 31, %v42_v14  ;;  %v43_v17 = vshrl.u32 %v42_v14, 5 }
  0x18   :  { %v45_v18 = vsub.s32 32, %v44_v15  ;;  %v47_v20 = vshll.u32 %v271_v19, %v44_v15  ;;  %v50_v22 = vshll.u32 %v272_v21, %v44_v15  ;;  %v53_v24 = vshll.u32 %v273_v23, %v44_v15 }
  0x19   :  { %v56_v26 = vshll.u32 %v274_v25, %v44_v15  ;;  %v59_v28 = vshll.u32 %v275_v27, %v44_v15  ;;  %vm62_vm1 = vcmp.lt.s32.totalorder %v43_v17, 1  ;;  %vm65_vm2 = vcmp.lt.s32.totalorder %v43_v17, 4 }
  0x1a   :  { %v46_v29 = vshrl.u32 %v271_v19, %v45_v18  ;;  %v48_v30 = vshrl.u32 %v272_v21, %v45_v18  ;;  %v51_v31 = vshrl.u32 %v273_v23, %v45_v18  ;;  %v54_v32 = vshrl.u32 %v274_v25, %v45_v18 }
  0x1b   :  { %v57_v33 = vshrl.u32 %v275_v27, %v45_v18  ;;  %v60_v35 = vshrl.u32 %v276_v34, %v45_v18  ;;  %vm63_vm3 = vcmp.lt.s32.totalorder %v43_v17, 2  ;;  %vm64_vm4 = vcmp.lt.s32.totalorder %v43_v17, 3 }
  0x1c   :  { %v49_v37 = vor.u32 %v48_v30, %v47_v20  ;;  %v52_v38 = vor.u32 %v51_v31, %v50_v22  ;;  %v55_v39 = vor.u32 %v54_v32, %v53_v24 }
  0x1d   :  { %v58_v40 = vor.u32 %v57_v33, %v56_v26  ;;  %v61_v41 = vor.u32 %v60_v35, %v59_v28 }
  0x1e   :  { %v66_v42 = vsel %vm62_vm1, %v46_v29, %v49_v37  ;;  %v67_v43 = vsel %vm65_vm2, %v55_v39, 2102212464  ;;  %v70_v44 = vsel %vm62_vm1, %v49_v37, %v52_v38  ;;  %v74_v45 = vsel %vm62_vm1, %v52_v38, %v55_v39 }
  0x1f   :  { %v68_v46 = vsel %vm64_vm4, %v52_v38, %v67_v43  ;;  %v71_v47 = vsel %vm65_vm2, %v58_v40, 920167782  ;;  %v75_v48 = vsel %vm65_vm2, %v61_v41, 1326507024 }
  0x20   :  { %v72_v49 = vsel %vm64_vm4, %v55_v39, %v71_v47  ;;  %v76_v50 = vsel %vm64_vm4, %v58_v40, %v75_v48  ;;  %v69_v51 = vsel %vm63_vm3, %v66_v42, %v68_v46 }
  0x21   :  { %v73_v52 = vsel %vm63_vm3, %v70_v44, %v72_v49  ;;  %v77_v53 = vsel %vm63_vm3, %v74_v45, %v76_v50  ;;  %v85_v58 = vmul.u32 %v78_v36, %v69_v51 }
  0x22   :  { %v304_v54 = vmul.u32.u64.low %v78_v36, %v77_v53  ;;  %v305_v55 = vmul.u32.u64.high %v78_v36, %v77_v53, %v304_v54  ;;  %v307_v56 = vmul.u32.u64.low %v78_v36, %v73_v52  ;;  %v308_v57 = vmul.u32.u64.high %v78_v36, %v73_v52, %v307_v56 }
  0x24   :  { %vm87_vm5 = vc.u32 %v305_v55, %v307_v56  ;;  %v88_v59 = vadd.s32 1, %v308_v57  ;;  %v86_v6 = vadd.s32 %v307_v56, %v305_v55 }
  0x26   :  { %v89_v60 = vsel %vm87_vm5, %v88_v59, %v308_v57 }
  0x27   :  { %v90_v61 = vadd.s32 %v89_v60, %v85_v58 }
  0x29   :  { %v91_v62 = vadd.s32 536870912, %v90_v61 }
  0x2b   :  { %v92_v63 = vshrl.u32 %v91_v62, 30 }
  0x2d   :  { %v93_v0 = vshll.u32 %v92_v63, 30  ;;  %v116_v21 = vsub.s32 4, %v92_v63 }
  0x2f   :  { %v94_v1 = vsub.s32 %v90_v61, %v93_v0  ;;  %v117_v24 = vsel %vm32_vm7, %v116_v21, %v92_v63 }
  0x30   :  { %v119_v26 = vsel %vm31_vm8, 0, %v117_v24 }
  0x31   :  { %v96_v2 = vsub.s32 0, %v94_v1  ;;  %v226_v27 = vadd.s32 3, %v119_v26  ;;  %v123_v28 = vand.u32 3, %v119_v26 }
  0x33   :  { %v250_v3 = vmin.u32 %v96_v2, %v94_v1  ;;  %v227_v29 = vand.u32 3, %v226_v27  ;;  %vm128_vm9 = vcmp.eq.s32.totalorder %v123_v28, 2  ;;  %vm125_vm11 = vcmp.eq.s32.totalorder %v123_v28, 0 }
  0x34   :  { %vm124_vm13 = vcmp.lt.s32.totalorder %v123_v28, 2 }
  0x35   :  { %v98_v4 = vclz %v250_v3  ;;  %vm232_vm10 = vcmp.eq.s32.totalorder %v227_v29, 2  ;;  %vm229_vm12 = vcmp.eq.s32.totalorder %v227_v29, 0  ;;  %vm228_vm14 = vcmp.lt.s32.totalorder %v227_v29, 2 }
  0x37   :  { %v251_v5 = vadd.s32 4294967294, %v98_v4 }
  0x39   :  { %vm252_vm6 = vcmp.lt.s32.totalorder %v251_v5, 0 }
  0x3a   :  { %v101_v8 = vsel %vm252_vm6, 0, %v251_v5 }
  0x3b   :  { %v102_v9 = vsub.s32 32, %v101_v8  ;;  %v103_v11 = vshll.u32 %v94_v1, %v101_v8  ;;  %v106_v12 = vsub.s32 4294967266, %v101_v8 }
  0x3d   :  { %v104_v13 = vshrl.u32 %v86_v6, %v102_v9  ;;  %v107_v14 = vadd.s32 127, %v106_v12 }
  0x3f   :  { %v105_v15 = vor.u32 %v104_v13, %v103_v11  ;;  %v108_v16 = vshll.u32 %v107_v14, 23 }
  0x41   :  { %v109_v17 = vor.u32 4788187, %v108_v16  ;;  %v112_v18 = vcvt.s32.f32 %v105_v15 }
  0x43   :  { %v110_v19 = vand.u32 2147483647, %v109_v17 }
  0x45   :  { %v113_v20 = vmul.f32 %v112_v18, %v110_v19 }
  0x47   :  { %v114_v22 = vxor.u32 2147483648, %v113_v20 }
  0x49   :  { %v115_v23 = vsel %vm32_vm7, %v114_v22, %v113_v20 }
  0x4a   :  { %v118_v25 = vsel %vm31_vm8, %v298_v7, %v115_v23 }
  0x4b   :  { %267 = vcosq.f32 %v118_v25 }
  0x4c   :  { %269 = vsinq.f32 %v118_v25 }
  0x58   :  { %v268_v30 = vpop.eup %267 }
  0x59   :  { %v270_v31 = vpop.eup %269  ;;  %v129_v32 = vxor.u32 2147483648, %v268_v30 }
  0x5a   :  { %v126_v10 = vxor.u32 2147483648, %v270_v31 }
  0x5b   :  { %v130_v33 = vsel %vm128_vm9, %v129_v32, %v270_v31  ;;  %v234_v34 = vsel %vm232_vm10, %v129_v32, %v270_v31 }
  0x5c   :  { %v127_v35 = vsel %vm125_vm11, %v268_v30, %v126_v10  ;;  %v231_v36 = vsel %vm229_vm12, %v268_v30, %v126_v10 }
  0x5d   :  { %v131_v37 = vsel %vm124_vm13, %v127_v35, %v130_v33  ;;  %v235_v38 = vsel %vm228_vm14, %v231_v36, %v234_v34 }
  0x5e   :  { %v132_v39 = vsel %vm122_vm15, nan, %v131_v37  ;;  %v236_v40 = vsel %vm122_vm15, nan, %v235_v38 }
  0x5f   :  { %237 = vst [vmem:[%s326_s1] sm:$0x3] %v132_v39  ;;  %238 = vst [vmem:[%s327_s2] sm:$0x3] %v236_v40 }

</bundles_post_ra>
